<compile_context>
chip_gen: v7x
topology: tpu7x:2x2x1
jax: 0.10.0
libtpu: 0.0.40
codegen_flags: <defaults>
</compile_context>

<pallas_src>
import functools

import jax
import jax.numpy as jnp
from jax.experimental import pallas as pl
from jax.experimental.pallas import tpu as pltpu


LANE = 128            # lanes per vreg
CHUNK_ROWS = 32       # sublane rows per in-register working chunk (~28 live vregs)
MAX_BLOCK_ROWS = 1024 # 2 MiB input + 0.5 MiB output per buffer at f32
MIN_PARALLEL_ROWS = 512  # only force >=2 grid tiles when each keeps >= this many rows


def _round_up(v, m):
    return -(-v // m) * m


def monotonic_kernel(w2_ref, b_ref, x_ref, o_ref, *, n_groups, n_units, n_inputs,
                     chunk_rows):
    """Pure-VPU tile: scalar-weighted feature sums, max over units, min over groups.

    w2_ref: SMEM [G*U*D]          pre-squared weights, flattened
    b_ref:  SMEM [G*U]            biases, flattened
    x_ref:  VMEM [D, ROWS, 128]   batch dense in sublanes + lanes
    o_ref:  VMEM [ROWS, 128]      sublane/lane-dense output
    """
    block_rows = o_ref.shape[0]

    # Pull the tiny constant parameters out of SMEM once (36 + 9 scalar reads).
    w2 = [w2_ref[i] for i in range(n_groups * n_units * n_inputs)]
    bias = [b_ref[i] for i in range(n_groups * n_units)]

    def do_chunk(r0, rows):
        # Dense [rows, 128] slabs, one per input feature.
        xs = [x_ref[d, pl.ds(r0, rows), :] for d in range(n_inputs)]
        result = None
        for g in range(n_groups):                       # static tiny loops: G=3, U=3, D=4
            gmax = None
            for u in range(n_units):
                idx = g * n_units + u
                base = idx * n_inputs
                z = xs[0] * w2[base]                    # scalar * dense vreg slab
                for d in range(1, n_inputs):
                    z = z + xs[d] * w2[base + d]
                z = z + bias[idx]
                gmax = z if gmax is None else jnp.maximum(gmax, z)           # max over hyperplanes
            result = gmax if result is None else jnp.minimum(result, gmax)   # min over groups
        o_ref[pl.ds(r0, rows), :] = result              # unmasked dense store

    if block_rows <= chunk_rows:
        do_chunk(0, block_rows)                         # small tile: single chunk, no loop
    else:
        # Wrapper guarantees block_rows % chunk_rows == 0: bounded live set per iteration.
        @pl.loop(0, block_rows // chunk_rows)
        def _(c):
            do_chunk(pl.multiple_of(c * chunk_rows, chunk_rows), chunk_rows)


def monotonic_network(w, b, *args, block_rows=None, min_kernel_batch=0):
    """Forward pass of MonotonicNetwork.

    w: [G, U, D] raw PositiveLinear weights (squared inside, as in the module)
    b: [G, U]    biases
    args: n_inputs separate 1-D arrays of length B (exactly like the PyTorch forward)
    returns: [B, 1] float32  ==  min_g max_u (x @ (w[g]**2).T + b[g])

    All groups must share the same n_units (true for groups=[3,3,3]); ragged group
    sizes would need per-group unit counts instead of a rectangular w.
    """
    G, U, D = w.shape
    assert len(args) == D, (len(args), D)

    # Contiguous concat of the per-feature vectors -> [D, B]; no strided transpose,
    # no whole-array zero-fill.
    x_df = jnp.stack([jnp.asarray(a, jnp.float32).reshape(-1) for a in args], axis=0)
    B = x_df.shape[1]

    # Square once here (not per grid step); flatten so they sit un-padded in SMEM.
    w2_flat = (w.astype(jnp.float32) ** 2).reshape(-1)    # [G*U*D]
    b_flat = b.astype(jnp.float32).reshape(-1)            # [G*U]

    if B < min_kernel_batch:
        # Optional tiny-batch fast path: one fused XLA einsum beats kernel launch cost.
        z = jnp.einsum("db,gud->gbu", x_df, w2_flat.reshape(G, U, D)) + b_flat.reshape(G, 1, U)
        return jnp.min(jnp.max(z, axis=-1), axis=0)[:, None]

    n_rows = pl.cdiv(B, LANE)

    # Block selection: biggest tile that fits comfortably; never force a 1-TC chip
    # (v5e/v6e) to split a small batch; create >=2 large parallel tiles only when there
    # is enough work so both of v7x's TensorCores get a full-sized block.
    if block_rows is None:
        if n_rows <= CHUNK_ROWS:
            block_rows = n_rows
        else:
            num_tiles = pl.cdiv(n_rows, MAX_BLOCK_ROWS)
            if num_tiles < 2 and n_rows >= 2 * MIN_PARALLEL_ROWS:
                num_tiles = 2
            block_rows = _round_up(pl.cdiv(n_rows, num_tiles), CHUNK_ROWS)
    else:
        block_rows = max(1, int(block_rows))
        if block_rows > CHUNK_ROWS:
            block_rows = _round_up(block_rows, CHUNK_ROWS)

    num_tiles = pl.cdiv(n_rows, block_rows)
    rows_pad = num_tiles * block_rows
    B_pad = rows_pad * LANE

    # Pad only the ragged tail, then view as [D, rows, 128] dense sublane+lane blocks.
    if B_pad != B:
        x_df = jnp.pad(x_df, ((0, 0), (0, B_pad - B)))
    xt = x_df.reshape(D, rows_pad, LANE)

    kernel = functools.partial(monotonic_kernel, n_groups=G, n_units=U, n_inputs=D,
                               chunk_rows=CHUNK_ROWS)
    out = pl.pallas_call(
        kernel,
        out_shape=jax.ShapeDtypeStruct((rows_pad, LANE), jnp.float32),
        grid=(num_tiles,),
        in_specs=[
            pl.BlockSpec(memory_space=pltpu.MemorySpace.SMEM),           # squared weights (flat)
            pl.BlockSpec(memory_space=pltpu.MemorySpace.SMEM),           # biases (flat)
            pl.BlockSpec((D, block_rows, LANE), lambda i: (0, i, 0)),    # dense batch tile
        ],
        out_specs=pl.BlockSpec((block_rows, LANE), lambda i: (i, 0)),    # dense output tile
        compiler_params=pltpu.CompilerParams(dimension_semantics=("parallel",)),
    )(w2_flat, b_flat, xt)

    return out.reshape(-1)[:B].reshape(B, 1)             # matches PyTorch y.t() -> [B, 1]


def _reference(w, b, *args):
    x = jnp.stack([jnp.asarray(a, jnp.float32) for a in args], axis=1)       # [B, D]
    z = (jnp.einsum("bd,gud->gbu", x, w.astype(jnp.float32) ** 2)
         + b.astype(jnp.float32)[:, None, :])                                # [G, B, U]
    return jnp.min(jnp.max(z, axis=-1), axis=0)[:, None]                     # [B, 1]


if __name__ == "__main__":
    key = jax.random.PRNGKey(0)
    n_inputs = 4
    groups = [3, 3, 3]
    G, U = len(groups), groups[0]

    kx, kw, kb = jax.random.split(key, 3)

    # Deterministic synthetic parameters (shapes from PositiveLinear(n_inputs, n_units)).
    w = 0.5 * jax.random.normal(kw, (G, U, n_inputs), dtype=jnp.float32)
    b = 0.1 * jax.random.normal(kb, (G, U), dtype=jnp.float32)

    # TODO(synk): hp_activations / group_activations (argmax/argmin bookkeeping lists on
    # the module) are side effects, not part of the returned tensor; not emitted here.

    # B=16: single partial tile; B=300: multi-row tile + ragged-tail padding;
    # B=5000: exercises the in-kernel chunk loop (block_rows > CHUNK_ROWS) + padding.
    for B in (16, 300, 5000):
        args = [
            jax.random.normal(jax.random.fold_in(kx, 1000 * B + i), (B,), dtype=jnp.float32)
            for i in range(n_inputs)
        ]
        y = jax.block_until_ready(monotonic_network(w, b, *args))
        ref = _reference(w, b, *args)
        assert y.shape == (B, 1), (B, y.shape)
        assert jnp.allclose(y, ref, atol=1e-5, rtol=1e-5), (B, float(jnp.max(jnp.abs(y - ref))))

    print("KERNEL_OK")
</pallas_src>

<mosaic_0001>
module attributes {stable_mosaic.version = 11 : i64} {
  func.func @monotonic_kernel(%arg0: i32, %arg1: memref<36xf32, #tpu.memory_space<smem>>, %arg2: memref<9xf32, #tpu.memory_space<smem>>, %arg3: memref<4x1x128xf32, #tpu.memory_space<vmem>>, %arg4: memref<1x128xf32, #tpu.memory_space<vmem>>) attributes {dimension_semantics = [#tpu.dimension_semantics<parallel>], iteration_bounds = array<i64: 1>, scalar_prefetch = 0 : i64, scratch_operands = 0 : i64, tpu.core_type = #tpu.core_type<tc>, window_params = [{transform_indices = @transform_0, window_bounds = array<i64: 36>}, {transform_indices = @transform_1, window_bounds = array<i64: 9>}, {transform_indices = @transform_2, window_bounds = array<i64: 4, 1, 128>}, {transform_indices = @transform_3, window_bounds = array<i64: 1, 128>}]} {
    %c0 = arith.constant 0 : index
    %0 = memref.load %arg1[%c0] : memref<36xf32, #tpu.memory_space<smem>>
    %c1 = arith.constant 1 : index
    %1 = memref.load %arg1[%c1] : memref<36xf32, #tpu.memory_space<smem>>
    %c2 = arith.constant 2 : index
    %2 = memref.load %arg1[%c2] : memref<36xf32, #tpu.memory_space<smem>>
    %c3 = arith.constant 3 : index
    %3 = memref.load %arg1[%c3] : memref<36xf32, #tpu.memory_space<smem>>
    %c4 = arith.constant 4 : index
    %4 = memref.load %arg1[%c4] : memref<36xf32, #tpu.memory_space<smem>>
    %c5 = arith.constant 5 : index
    %5 = memref.load %arg1[%c5] : memref<36xf32, #tpu.memory_space<smem>>
    %c6 = arith.constant 6 : index
    %6 = memref.load %arg1[%c6] : memref<36xf32, #tpu.memory_space<smem>>
    %c7 = arith.constant 7 : index
    %7 = memref.load %arg1[%c7] : memref<36xf32, #tpu.memory_space<smem>>
    %c8 = arith.constant 8 : index
    %8 = memref.load %arg1[%c8] : memref<36xf32, #tpu.memory_space<smem>>
    %c9 = arith.constant 9 : index
    %9 = memref.load %arg1[%c9] : memref<36xf32, #tpu.memory_space<smem>>
    %c10 = arith.constant 10 : index
    %10 = memref.load %arg1[%c10] : memref<36xf32, #tpu.memory_space<smem>>
    %c11 = arith.constant 11 : index
    %11 = memref.load %arg1[%c11] : memref<36xf32, #tpu.memory_space<smem>>
    %c12 = arith.constant 12 : index
    %12 = memref.load %arg1[%c12] : memref<36xf32, #tpu.memory_space<smem>>
    %c13 = arith.constant 13 : index
    %13 = memref.load %arg1[%c13] : memref<36xf32, #tpu.memory_space<smem>>
    %c14 = arith.constant 14 : index
    %14 = memref.load %arg1[%c14] : memref<36xf32, #tpu.memory_space<smem>>
    %c15 = arith.constant 15 : index
    %15 = memref.load %arg1[%c15] : memref<36xf32, #tpu.memory_space<smem>>
    %c16 = arith.constant 16 : index
    %16 = memref.load %arg1[%c16] : memref<36xf32, #tpu.memory_space<smem>>
    %c17 = arith.constant 17 : index
    %17 = memref.load %arg1[%c17] : memref<36xf32, #tpu.memory_space<smem>>
    %c18 = arith.constant 18 : index
    %18 = memref.load %arg1[%c18] : memref<36xf32, #tpu.memory_space<smem>>
    %c19 = arith.constant 19 : index
    %19 = memref.load %arg1[%c19] : memref<36xf32, #tpu.memory_space<smem>>
    %c20 = arith.constant 20 : index
    %20 = memref.load %arg1[%c20] : memref<36xf32, #tpu.memory_space<smem>>
    %c21 = arith.constant 21 : index
    %21 = memref.load %arg1[%c21] : memref<36xf32, #tpu.memory_space<smem>>
    %c22 = arith.constant 22 : index
    %22 = memref.load %arg1[%c22] : memref<36xf32, #tpu.memory_space<smem>>
    %c23 = arith.constant 23 : index
    %23 = memref.load %arg1[%c23] : memref<36xf32, #tpu.memory_space<smem>>
    %c24 = arith.constant 24 : index
    %24 = memref.load %arg1[%c24] : memref<36xf32, #tpu.memory_space<smem>>
    %c25 = arith.constant 25 : index
    %25 = memref.load %arg1[%c25] : memref<36xf32, #tpu.memory_space<smem>>
    %c26 = arith.constant 26 : index
    %26 = memref.load %arg1[%c26] : memref<36xf32, #tpu.memory_space<smem>>
    %c27 = arith.constant 27 : index
    %27 = memref.load %arg1[%c27] : memref<36xf32, #tpu.memory_space<smem>>
    %c28 = arith.constant 28 : index
    %28 = memref.load %arg1[%c28] : memref<36xf32, #tpu.memory_space<smem>>
    %c29 = arith.constant 29 : index
    %29 = memref.load %arg1[%c29] : memref<36xf32, #tpu.memory_space<smem>>
    %c30 = arith.constant 30 : index
    %30 = memref.load %arg1[%c30] : memref<36xf32, #tpu.memory_space<smem>>
    %c31 = arith.constant 31 : index
    %31 = memref.load %arg1[%c31] : memref<36xf32, #tpu.memory_space<smem>>
    %c32 = arith.constant 32 : index
    %32 = memref.load %arg1[%c32] : memref<36xf32, #tpu.memory_space<smem>>
    %c33 = arith.constant 33 : index
    %33 = memref.load %arg1[%c33] : memref<36xf32, #tpu.memory_space<smem>>
    %c34 = arith.constant 34 : index
    %34 = memref.load %arg1[%c34] : memref<36xf32, #tpu.memory_space<smem>>
    %c35 = arith.constant 35 : index
    %35 = memref.load %arg1[%c35] : memref<36xf32, #tpu.memory_space<smem>>
    %c0_0 = arith.constant 0 : index
    %36 = memref.load %arg2[%c0_0] : memref<9xf32, #tpu.memory_space<smem>>
    %c1_1 = arith.constant 1 : index
    %37 = memref.load %arg2[%c1_1] : memref<9xf32, #tpu.memory_space<smem>>
    %c2_2 = arith.constant 2 : index
    %38 = memref.load %arg2[%c2_2] : memref<9xf32, #tpu.memory_space<smem>>
    %c3_3 = arith.constant 3 : index
    %39 = memref.load %arg2[%c3_3] : memref<9xf32, #tpu.memory_space<smem>>
    %c4_4 = arith.constant 4 : index
    %40 = memref.load %arg2[%c4_4] : memref<9xf32, #tpu.memory_space<smem>>
    %c5_5 = arith.constant 5 : index
    %41 = memref.load %arg2[%c5_5] : memref<9xf32, #tpu.memory_space<smem>>
    %c6_6 = arith.constant 6 : index
    %42 = memref.load %arg2[%c6_6] : memref<9xf32, #tpu.memory_space<smem>>
    %c7_7 = arith.constant 7 : index
    %43 = memref.load %arg2[%c7_7] : memref<9xf32, #tpu.memory_space<smem>>
    %c8_8 = arith.constant 8 : index
    %44 = memref.load %arg2[%c8_8] : memref<9xf32, #tpu.memory_space<smem>>
    %c0_9 = arith.constant 0 : index
    %c0_10 = arith.constant 0 : index
    %c0_11 = arith.constant 0 : index
    %45 = vector.load %arg3[%c0_9, %c0_10, %c0_11] : memref<4x1x128xf32, #tpu.memory_space<vmem>>, vector<1x1x128xf32>
    %46 = vector.shape_cast %45 : vector<1x1x128xf32> to vector<1x128xf32>
    %c1_12 = arith.constant 1 : index
    %c0_13 = arith.constant 0 : index
    %c0_14 = arith.constant 0 : index
    %47 = vector.load %arg3[%c1_12, %c0_13, %c0_14] : memref<4x1x128xf32, #tpu.memory_space<vmem>>, vector<1x1x128xf32>
    %48 = vector.shape_cast %47 : vector<1x1x128xf32> to vector<1x128xf32>
    %c2_15 = arith.constant 2 : index
    %c0_16 = arith.constant 0 : index
    %c0_17 = arith.constant 0 : index
    %49 = vector.load %arg3[%c2_15, %c0_16, %c0_17] : memref<4x1x128xf32, #tpu.memory_space<vmem>>, vector<1x1x128xf32>
    %50 = vector.shape_cast %49 : vector<1x1x128xf32> to vector<1x128xf32>
    %c3_18 = arith.constant 3 : index
    %c0_19 = arith.constant 0 : index
    %c0_20 = arith.constant 0 : index
    %51 = vector.load %arg3[%c3_18, %c0_19, %c0_20] : memref<4x1x128xf32, #tpu.memory_space<vmem>>, vector<1x1x128xf32>
    %52 = vector.shape_cast %51 : vector<1x1x128xf32> to vector<1x128xf32>
    %53 = vector.broadcast %0 : f32 to vector<1x128xf32>
    %54 = arith.mulf %46, %53 : vector<1x128xf32>
    %55 = vector.broadcast %1 : f32 to vector<1x128xf32>
    %56 = arith.mulf %48, %55 : vector<1x128xf32>
    %57 = arith.addf %54, %56 : vector<1x128xf32>
    %58 = vector.broadcast %2 : f32 to vector<1x128xf32>
    %59 = arith.mulf %50, %58 : vector<1x128xf32>
    %60 = arith.addf %57, %59 : vector<1x128xf32>
    %61 = vector.broadcast %3 : f32 to vector<1x128xf32>
    %62 = arith.mulf %52, %61 : vector<1x128xf32>
    %63 = arith.addf %60, %62 : vector<1x128xf32>
    %64 = vector.broadcast %36 : f32 to vector<1x128xf32>
    %65 = arith.addf %63, %64 : vector<1x128xf32>
    %66 = vector.broadcast %4 : f32 to vector<1x128xf32>
    %67 = arith.mulf %46, %66 : vector<1x128xf32>
    %68 = vector.broadcast %5 : f32 to vector<1x128xf32>
    %69 = arith.mulf %48, %68 : vector<1x128xf32>
    %70 = arith.addf %67, %69 : vector<1x128xf32>
    %71 = vector.broadcast %6 : f32 to vector<1x128xf32>
    %72 = arith.mulf %50, %71 : vector<1x128xf32>
    %73 = arith.addf %70, %72 : vector<1x128xf32>
    %74 = vector.broadcast %7 : f32 to vector<1x128xf32>
    %75 = arith.mulf %52, %74 : vector<1x128xf32>
    %76 = arith.addf %73, %75 : vector<1x128xf32>
    %77 = vector.broadcast %37 : f32 to vector<1x128xf32>
    %78 = arith.addf %76, %77 : vector<1x128xf32>
    %79 = arith.maximumf %65, %78 : vector<1x128xf32>
    %80 = vector.broadcast %8 : f32 to vector<1x128xf32>
    %81 = arith.mulf %46, %80 : vector<1x128xf32>
    %82 = vector.broadcast %9 : f32 to vector<1x128xf32>
    %83 = arith.mulf %48, %82 : vector<1x128xf32>
    %84 = arith.addf %81, %83 : vector<1x128xf32>
    %85 = vector.broadcast %10 : f32 to vector<1x128xf32>
    %86 = arith.mulf %50, %85 : vector<1x128xf32>
    %87 = arith.addf %84, %86 : vector<1x128xf32>
    %88 = vector.broadcast %11 : f32 to vector<1x128xf32>
    %89 = arith.mulf %52, %88 : vector<1x128xf32>
    %90 = arith.addf %87, %89 : vector<1x128xf32>
    %91 = vector.broadcast %38 : f32 to vector<1x128xf32>
    %92 = arith.addf %90, %91 : vector<1x128xf32>
    %93 = arith.maximumf %79, %92 : vector<1x128xf32>
    %94 = vector.broadcast %12 : f32 to vector<1x128xf32>
    %95 = arith.mulf %46, %94 : vector<1x128xf32>
    %96 = vector.broadcast %13 : f32 to vector<1x128xf32>
    %97 = arith.mulf %48, %96 : vector<1x128xf32>
    %98 = arith.addf %95, %97 : vector<1x128xf32>
    %99 = vector.broadcast %14 : f32 to vector<1x128xf32>
    %100 = arith.mulf %50, %99 : vector<1x128xf32>
    %101 = arith.addf %98, %100 : vector<1x128xf32>
    %102 = vector.broadcast %15 : f32 to vector<1x128xf32>
    %103 = arith.mulf %52, %102 : vector<1x128xf32>
    %104 = arith.addf %101, %103 : vector<1x128xf32>
    %105 = vector.broadcast %39 : f32 to vector<1x128xf32>
    %106 = arith.addf %104, %105 : vector<1x128xf32>
    %107 = vector.broadcast %16 : f32 to vector<1x128xf32>
    %108 = arith.mulf %46, %107 : vector<1x128xf32>
    %109 = vector.broadcast %17 : f32 to vector<1x128xf32>
    %110 = arith.mulf %48, %109 : vector<1x128xf32>
    %111 = arith.addf %108, %110 : vector<1x128xf32>
    %112 = vector.broadcast %18 : f32 to vector<1x128xf32>
    %113 = arith.mulf %50, %112 : vector<1x128xf32>
    %114 = arith.addf %111, %113 : vector<1x128xf32>
    %115 = vector.broadcast %19 : f32 to vector<1x128xf32>
    %116 = arith.mulf %52, %115 : vector<1x128xf32>
    %117 = arith.addf %114, %116 : vector<1x128xf32>
    %118 = vector.broadcast %40 : f32 to vector<1x128xf32>
    %119 = arith.addf %117, %118 : vector<1x128xf32>
    %120 = arith.maximumf %106, %119 : vector<1x128xf32>
    %121 = vector.broadcast %20 : f32 to vector<1x128xf32>
    %122 = arith.mulf %46, %121 : vector<1x128xf32>
    %123 = vector.broadcast %21 : f32 to vector<1x128xf32>
    %124 = arith.mulf %48, %123 : vector<1x128xf32>
    %125 = arith.addf %122, %124 : vector<1x128xf32>
    %126 = vector.broadcast %22 : f32 to vector<1x128xf32>
    %127 = arith.mulf %50, %126 : vector<1x128xf32>
    %128 = arith.addf %125, %127 : vector<1x128xf32>
    %129 = vector.broadcast %23 : f32 to vector<1x128xf32>
    %130 = arith.mulf %52, %129 : vector<1x128xf32>
    %131 = arith.addf %128, %130 : vector<1x128xf32>
    %132 = vector.broadcast %41 : f32 to vector<1x128xf32>
    %133 = arith.addf %131, %132 : vector<1x128xf32>
    %134 = arith.maximumf %120, %133 : vector<1x128xf32>
    %135 = arith.minimumf %93, %134 : vector<1x128xf32>
    %136 = vector.broadcast %24 : f32 to vector<1x128xf32>
    %137 = arith.mulf %46, %136 : vector<1x128xf32>
    %138 = vector.broadcast %25 : f32 to vector<1x128xf32>
    %139 = arith.mulf %48, %138 : vector<1x128xf32>
    %140 = arith.addf %137, %139 : vector<1x128xf32>
    %141 = vector.broadcast %26 : f32 to vector<1x128xf32>
    %142 = arith.mulf %50, %141 : vector<1x128xf32>
    %143 = arith.addf %140, %142 : vector<1x128xf32>
    %144 = vector.broadcast %27 : f32 to vector<1x128xf32>
    %145 = arith.mulf %52, %144 : vector<1x128xf32>
    %146 = arith.addf %143, %145 : vector<1x128xf32>
    %147 = vector.broadcast %42 : f32 to vector<1x128xf32>
    %148 = arith.addf %146, %147 : vector<1x128xf32>
    %149 = vector.broadcast %28 : f32 to vector<1x128xf32>
    %150 = arith.mulf %46, %149 : vector<1x128xf32>
    %151 = vector.broadcast %29 : f32 to vector<1x128xf32>
    %152 = arith.mulf %48, %151 : vector<1x128xf32>
    %153 = arith.addf %150, %152 : vector<1x128xf32>
    %154 = vector.broadcast %30 : f32 to vector<1x128xf32>
    %155 = arith.mulf %50, %154 : vector<1x128xf32>
    %156 = arith.addf %153, %155 : vector<1x128xf32>
    %157 = vector.broadcast %31 : f32 to vector<1x128xf32>
    %158 = arith.mulf %52, %157 : vector<1x128xf32>
    %159 = arith.addf %156, %158 : vector<1x128xf32>
    %160 = vector.broadcast %43 : f32 to vector<1x128xf32>
    %161 = arith.addf %159, %160 : vector<1x128xf32>
    %162 = arith.maximumf %148, %161 : vector<1x128xf32>
    %163 = vector.broadcast %32 : f32 to vector<1x128xf32>
    %164 = arith.mulf %46, %163 : vector<1x128xf32>
    %165 = vector.broadcast %33 : f32 to vector<1x128xf32>
    %166 = arith.mulf %48, %165 : vector<1x128xf32>
    %167 = arith.addf %164, %166 : vector<1x128xf32>
    %168 = vector.broadcast %34 : f32 to vector<1x128xf32>
    %169 = arith.mulf %50, %168 : vector<1x128xf32>
    %170 = arith.addf %167, %169 : vector<1x128xf32>
    %171 = vector.broadcast %35 : f32 to vector<1x128xf32>
    %172 = arith.mulf %52, %171 : vector<1x128xf32>
    %173 = arith.addf %170, %172 : vector<1x128xf32>
    %174 = vector.broadcast %44 : f32 to vector<1x128xf32>
    %175 = arith.addf %173, %174 : vector<1x128xf32>
    %176 = arith.maximumf %162, %175 : vector<1x128xf32>
    %177 = arith.minimumf %135, %176 : vector<1x128xf32>
    %c0_21 = arith.constant 0 : index
    %c0_22 = arith.constant 0 : index
    %178 = vector.load %arg4[%c0_21, %c0_22] : memref<1x128xf32, #tpu.memory_space<vmem>>, vector<1x128xf32>
    tpu.vector_store %arg4[%c0_21, %c0_22], %177 {strides = array<i32>} : memref<1x128xf32, #tpu.memory_space<vmem>>, vector<1x128xf32>,
    return
  }
  func.func @transform_0(%arg0: i32) -> i32 {
    %c0_i32 = arith.constant 0 : i32
    %c0_i32_0 = arith.constant 0 : i32
    return %c0_i32 : i32
  }
  func.func @transform_1(%arg0: i32) -> i32 {
    %c0_i32 = arith.constant 0 : i32
    %c0_i32_0 = arith.constant 0 : i32
    return %c0_i32 : i32
  }
  func.func @transform_2(%arg0: i32) -> (i32, i32, i32) {
    %c0_i32 = arith.constant 0 : i32
    %c0_i32_0 = arith.constant 0 : i32
    %c0_i32_1 = arith.constant 0 : i32
    return %c0_i32, %arg0, %c0_i32_0 : i32, i32, i32
  }
  func.func @transform_3(%arg0: i32) -> (i32, i32) {
    %c0_i32 = arith.constant 0 : i32
    %c0_i32_0 = arith.constant 0 : i32
    return %arg0, %c0_i32 : i32, i32
  }
}

</mosaic_0001>

<bundles_post_ra>
// kernel: tpu_custom_call.1
= control target key start
LH: loop header
LB: loop body
LE: loop exit
PB: predicated region body
PF: predicated region fallthrough
CT: control target
= control target key end

     0   :  { %8 = vsyncpa [#allocation4], 0  ;;  %s557_s0 = inlined_call_operand.hbm [shape: f32[36], index: 0, kind: input, shape index: {}]   ;;  %s558_s1 = inlined_call_operand.vmem [shape: f32[9], index: 1, kind: input, shape index: {}]   ;;  %s559_s2 = inlined_call_operand.vmem [shape: f32[4,1,128], index: 2, kind: input, shape index: {}]   ;;  %s560_s3 = inlined_call_operand.hbm [shape: f32[1,128], index: 3, kind: output, shape index: {}]  }
   0x1   :  { %9 = vsyncpa [#allocation5], 0 }
   0x2   :  { %10 = vsyncpa [#allocation3], 0  ;;  %s25_s14 = sshll.u32 %s558_s1, 4  ;;  %s281_s17 = scalar_lea.hbm %s557_s0, 16  ;;  %s26_s14 = int_to_ptr.vmem [resolvable:$true] %s25_s14 }
   0x3   :  { %p282_p0 = scmp.ne.s32.totalorder %s557_s0, %s281_s17  ;;  %p285_p1 = scmp.lt.u32.totalorder %s281_s17, %s557_s0 }
   0x5   :  { %p287_p2 = pnand %p285_p1, %p282_p0 }
   0x7   :  { %290 = shalt.err (!%p287_p2)
}
   0x8   :  { %s331_s22 = smov [#allocation2]   ;;  %s291_s1 = scalar_lea.vmem %s26_s14, 16 }
   0x9   :  { %18 = dma.hbm_to_smem %s557_s0, 16, %s331_s22, [#allocation4]  }
   0xa   :  { %p292_p3 = scmp.ne.s32.totalorder %s26_s14, %s291_s1  ;;  %p296_p4 = scmp.lt.s32.totalorder %s26_s14, %s26_s14 }
   0xb   :  { %p297_p5 = scmp.lt.s32.totalorder %s291_s1, %s291_s1 }
   0xd   :  { %p298_p6 = por %p297_p5, %p296_p4 }
   0xf   :  { %p299_p7 = pnand %p298_p6, %p292_p3 }
  0x11   :  { %302 = shalt.err (!%p299_p7)
}
  0x12   :  { %s332_s25 = smov [#allocation6]  }
  0x13   :  { %28 = dma.vmem_to_smem %s26_s14, 16, %s332_s25, [#allocation5]  }
  0x14   :  { %325 = dma.done.wait [#allocation4], 16  }
  0x15   :  { %326 = vsyncadd [#allocation4], 4294967280 }
  0x16   :  { %327 = dma.done.wait [#allocation5], 16  }
  0x17   :  { %328 = vsyncadd [#allocation5], 4294967280 }
  0x18   :  { %37 = sfence }
  0x19   :  { %s38_s26 = sld [smem:[#allocation2]]  ;;  %s232_s27 = sld [smem:[#allocation2 + $0x1]]  ;;  %v372_v0 = vld [vmem:[%s559_s2] sm:$0x1]  ;;  %v381_v1 = vld [vmem:[%s559_s2 + $0x1] sm:$0x1] }
  0x1a   :  { %s233_s28 = sld [smem:[#allocation2 + $0x2]]  ;;  %s234_s29 = sld [smem:[#allocation2 + $0x3]]  ;;  %v390_v2 = vld [vmem:[%s559_s2 + $0x2] sm:$0x1]  ;;  %v399_v3 = vld [vmem:[%s559_s2 + $0x3] sm:$0x1] }
  0x1b   :  { %s235_s0 = sld [smem:[#allocation2 + $0x4]]  ;;  %s236_s30 = sld [smem:[#allocation2 + $0x5]] }
  0x1c   :  { %s374_s6 = sld [smem:[#allocation2 + $0x6]]  ;;  %s376_s7 = sld [smem:[#allocation2 + $0x7]] }
  0x1d   :  { %s383_s10 = sld [smem:[#allocation2 + $0x8]]  ;;  %s385_s11 = sld [smem:[#allocation2 + $0x9]] }
  0x1e   :  { %s392_s14 = sld [smem:[#allocation2 + $0xa]]  ;;  %s394_s15 = sld [smem:[#allocation2 + $0xb]] }
  0x1f   :  { %s401_s18 = sld [smem:[#allocation2 + $0xc]]  ;;  %s403_s19 = sld [smem:[#allocation2 + $0xd]]  ;;  %v90_v4 = vstv %s38_s26  ;;  %v92_v5 = vstv %s232_s27 }
  0x20   :  { %s405_s20 = sld [smem:[#allocation2 + $0xe]]  ;;  %s407_s21 = sld [smem:[#allocation2 + $0xf]]  ;;  %v91_v6 = vmul.f32 %v90_v4, %v372_v0  ;;  %v93_v7 = vmul.f32 %v381_v1, %v92_v5  ;;  %v95_v8 = vstv %s233_s28  ;;  %v98_v9 = vstv %s234_s29 }
  0x21   :  { %s411_s2 = sld [smem:[#allocation2 + $0x10]]  ;;  %s413_s22 = sld [smem:[#allocation2 + $0x11]]  ;;  %v96_v10 = vmul.f32 %v390_v2, %v95_v8  ;;  %v99_v11 = vmul.f32 %v399_v3, %v98_v9  ;;  %v103_v12 = vstv %s235_s0  ;;  %v105_v13 = vstv %s236_s30 }
  0x22   :  { %s417_s23 = sld [smem:[#allocation2 + $0x12]]  ;;  %v94_v14 = vadd.f32 %v93_v7, %v91_v6  ;;  %v104_v15 = vmul.f32 %v103_v12, %v372_v0  ;;  %v106_v16 = vmul.f32 %v381_v1, %v105_v13  ;;  %v108_v17 = vstv %s374_s6  ;;  %s422_s24 = sld [smem:[#allocation2 + $0x13]] }
  0x23   :  { %s424_s1 = sld [smem:[#allocation2 + $0x14]]  ;;  %v109_v18 = vmul.f32 %v390_v2, %v108_v17  ;;  %v111_v19 = vstv %s376_s7  ;;  %v117_v20 = vstv %s383_s10  ;;  %v119_v21 = vstv %s385_s11  ;;  %s430_s25 = sld [smem:[#allocation2 + $0x15]] }
  0x24   :  { %s432_s26 = sld [smem:[#allocation2 + $0x16]]  ;;  %v97_v22 = vadd.f32 %v96_v10, %v94_v14  ;;  %v107_v23 = vadd.f32 %v106_v16, %v104_v15  ;;  %v112_v24 = vmul.f32 %v399_v3, %v111_v19  ;;  %v118_v25 = vmul.f32 %v117_v20, %v372_v0  ;;  %s436_s27 = sld [smem:[#allocation2 + $0x17]] }
  0x25   :  { %s438_s28 = sld [smem:[#allocation2 + $0x18]]  ;;  %v120_v26 = vmul.f32 %v381_v1, %v119_v21  ;;  %v122_v27 = vstv %s392_s14  ;;  %v125_v28 = vstv %s394_s15  ;;  %v131_v29 = vstv %s401_s18  ;;  %s448_s29 = sld [smem:[#allocation2 + $0x19]] }
  0x26   :  { %v444_v30 = vadd.f32 %v99_v11, %v97_v22  ;;  %v110_v31 = vadd.f32 %v109_v18, %v107_v23  ;;  %v123_v32 = vmul.f32 %v390_v2, %v122_v27  ;;  %v126_v33 = vmul.f32 %v399_v3, %v125_v28  ;;  %s450_s0 = sld [smem:[#allocation2 + $0x1a]]  ;;  %s458_s30 = sld [smem:[#allocation2 + $0x1b]] }
  0x27   :  { %v121_v34 = vadd.f32 %v120_v26, %v118_v25  ;;  %v132_v35 = vmul.f32 %v131_v29, %v372_v0  ;;  %v133_v36 = vstv %s403_s19  ;;  %v136_v37 = vstv %s405_s20  ;;  %s460_s4 = sld [smem:[#allocation2 + $0x1c]]  ;;  %s468_s5 = sld [smem:[#allocation6]] }
  0x28   :  { %v113_v38 = vadd.f32 %v112_v24, %v110_v31  ;;  %v134_v39 = vmul.f32 %v381_v1, %v133_v36  ;;  %v137_v40 = vmul.f32 %v390_v2, %v136_v37  ;;  %v139_v41 = vstv %s407_s21  ;;  %s470_s6 = sld [smem:[#allocation6 + $0x1]]  ;;  %s475_s7 = sld [smem:[#allocation6 + $0x2]] }
  0x29   :  { %v124_v42 = vadd.f32 %v123_v32, %v121_v34  ;;  %v140_v43 = vmul.f32 %v399_v3, %v139_v41  ;;  %v144_v44 = vstv %s411_s2  ;;  %v146_v45 = vstv %s413_s22  ;;  %s477_s8 = sld [smem:[#allocation6 + $0x3]]  ;;  %s481_s9 = sld [smem:[#allocation6 + $0x4]] }
  0x2a   :  { %v135_v46 = vadd.f32 %v134_v39, %v132_v35  ;;  %v145_v47 = vmul.f32 %v144_v44, %v372_v0  ;;  %v147_v48 = vmul.f32 %v381_v1, %v146_v45  ;;  %v149_v49 = vstv %s417_s23  ;;  %s487_s10 = sld [smem:[#allocation2 + $0x1d]]  ;;  %s489_s11 = sld [smem:[#allocation2 + $0x1e]] }
  0x2b   :  { %v127_v50 = vadd.f32 %v126_v33, %v124_v42  ;;  %v150_v51 = vmul.f32 %v390_v2, %v149_v49  ;;  %v152_v52 = vstv %s422_s24  ;;  %v158_v53 = vstv %s424_s1  ;;  %s493_s12 = sld [smem:[#allocation2 + $0x1f]]  ;;  %s495_s13 = sld [smem:[#allocation6 + $0x5]] }
  0x2c   :  { %v138_v54 = vadd.f32 %v137_v40, %v135_v46  ;;  %v148_v55 = vadd.f32 %v147_v48, %v145_v47  ;;  %v153_v56 = vmul.f32 %v399_v3, %v152_v52  ;;  %v159_v57 = vmul.f32 %v158_v53, %v372_v0  ;;  %s501_s14 = sld [smem:[#allocation6 + $0x6]]  ;;  %s505_s15 = sld [smem:[#allocation2 + $0x20]] }
  0x2d   :  { %v160_v58 = vstv %s430_s25  ;;  %v163_v59 = vstv %s432_s26  ;;  %v166_v60 = vstv %s436_s27  ;;  %v173_v61 = vstv %s438_s28  ;;  %s507_s16 = sld [smem:[#allocation2 + $0x21]]  ;;  %s513_s17 = sld [smem:[#allocation2 + $0x22]] }
  0x2e   :  { %v141_v62 = vadd.f32 %v140_v43, %v138_v54  ;;  %v151_v63 = vadd.f32 %v150_v51, %v148_v55  ;;  %v161_v4 = vmul.f32 %v381_v1, %v160_v58  ;;  %v164_v5 = vmul.f32 %v390_v2, %v163_v59  ;;  %s518_s18 = sld [smem:[#allocation2 + $0x23]]  ;;  %s521_s19 = sld [smem:[#allocation6 + $0x7]] }
  0x2f   :  { %v167_v6 = vmul.f32 %v399_v3, %v166_v60  ;;  %v174_v7 = vmul.f32 %v173_v61, %v372_v0  ;;  %v175_v8 = vstv %s448_s29  ;;  %v178_v9 = vstv %s450_s0  ;;  %s526_s20 = sld [smem:[#allocation6 + $0x8]]  ;;  %s333_s21 = smov [#allocation7]  }
  0x30   :  { %v154_v10 = vadd.f32 %v153_v56, %v151_v63  ;;  %v162_v11 = vadd.f32 %v161_v4, %v159_v57  ;;  %v176_v12 = vmul.f32 %v381_v1, %v175_v8  ;;  %v179_v13 = vmul.f32 %v390_v2, %v178_v9  ;;  %s222_s2 = sshll.u32 %s333_s21, 4  ;;  %s223_s2 = int_to_ptr.vmem [resolvable:$true] %s222_s2 }
  0x31   :  { %v101_v14 = vstv %s468_s5  ;;  %v114_v15 = vstv %s470_s6  ;;  %v181_v16 = vstv %s458_s30  ;;  %v186_v17 = vstv %s460_s4  ;;  %s303_s22 = scalar_lea.vmem %s223_s2, 16  ;;  %s307_s23 = scalar_lea.vmem %s223_s2, 32 }
  0x32   :  { %v102_v18 = vadd.f32 %v101_v14, %v444_v30  ;;  %v115_v19 = vadd.f32 %v114_v15, %v113_v38  ;;  %v128_v20 = vstv %s475_s7  ;;  %v142_v21 = vstv %s477_s8  ;;  %p304_p8 = scmp.ne.s32.totalorder %s223_s2, %s303_s22  ;;  %p308_p9 = scmp.lt.s32.totalorder %s223_s2, %s223_s2 }
  0x33   :  { %v155_v22 = vstv %s481_s9  ;;  %v165_v23 = vadd.f32 %v164_v5, %v162_v11  ;;  %v143_v24 = vadd.f32 %v142_v21, %v141_v62  ;;  %v177_v26 = vadd.f32 %v176_v12, %v174_v7  ;;  %p309_p10 = scmp.lt.s32.totalorder %s307_s23, %s303_s22 }
  0x34   :  { %v156_v25 = vadd.f32 %v155_v22, %v154_v10  ;;  %v129_v27 = vadd.f32 %v128_v20, %v127_v50  ;;  %v182_v28 = vmul.f32 %v399_v3, %v181_v16  ;;  %v187_v29 = vmul.f32 %v186_v17, %v372_v0 }
  0x35   :  { %v116_v30 = vmax.f32 %v102_v18, %v115_v19  ;;  %v168_v31 = vadd.f32 %v167_v6, %v165_v23  ;;  %v180_v32 = vadd.f32 %v179_v13, %v177_v26  ;;  %v188_v33 = vstv %s487_s10  ;;  %p310_p11 = por %p309_p10, %p308_p9 }
  0x36   :  { %v169_v34 = vstv %s495_s13  ;;  %v189_v35 = vmul.f32 %v381_v1, %v188_v33  ;;  %v191_v36 = vstv %s489_s11  ;;  %v194_v37 = vstv %s493_s12 }
  0x37   :  { %v157_v38 = vmax.f32 %v143_v24, %v156_v25  ;;  %v183_v39 = vadd.f32 %v182_v28, %v180_v32  ;;  %v184_v40 = vstv %s501_s14  ;;  %v192_v41 = vmul.f32 %v390_v2, %v191_v36  ;;  %p311_p12 = pnand %p310_p11, %p304_p8 }
  0x38   :  { %v190_v42 = vadd.f32 %v189_v35, %v187_v29  ;;  %v195_v43 = vmul.f32 %v399_v3, %v194_v37  ;;  %v200_v44 = vstv %s505_s15  ;;  %v202_v45 = vstv %s507_s16 }
  0x39   :  { %v170_v46 = vadd.f32 %v169_v34, %v168_v31  ;;  %v201_v47 = vmul.f32 %v200_v44, %v372_v0  ;;  %v203_v48 = vmul.f32 %v381_v1, %v202_v45  ;;  %v205_v49 = vstv %s513_s17 }
  0x3a   :  { %v193_v50 = vadd.f32 %v192_v41, %v190_v42  ;;  %v206_v51 = vmul.f32 %v390_v2, %v205_v49  ;;  %v208_v52 = vstv %s518_s18  ;;  %v197_v53 = vstv %s521_s19 }
  0x3b   :  { %v204_v54 = vadd.f32 %v203_v48, %v201_v47  ;;  %v209_v55 = vmul.f32 %v399_v3, %v208_v52  ;;  %v185_v56 = vadd.f32 %v184_v40, %v183_v39  ;;  %v130_v58 = vmax.f32 %v116_v30, %v129_v27 }
  0x3c   :  { %v196_v57 = vadd.f32 %v195_v43, %v193_v50  ;;  %v171_v59 = vmax.f32 %v157_v38, %v170_v46  ;;  %v211_v62 = vstv %s526_s20 }
  0x3d   :  { %v207_v60 = vadd.f32 %v206_v51, %v204_v54 }
  0x3e   :  { %v198_v61 = vadd.f32 %v197_v53, %v196_v57  ;;  %v172_v4 = vmin.f32 %v130_v58, %v171_v59 }
  0x3f   :  { %v210_v63 = vadd.f32 %v209_v55, %v207_v60 }
  0x40   :  { %v199_v0 = vmax.f32 %v185_v56, %v198_v61 }
  0x41   :  { %v212_v1 = vadd.f32 %v211_v62, %v210_v63 }
  0x43   :  { %v213_v5 = vmax.f32 %v199_v0, %v212_v1 }
  0x45   :  { %v214_v2 = vmin.f32 %v172_v4, %v213_v5 }
  0x47   :  { %215 = vst [vmem:[#allocation7] sm:$0x1] %v214_v2 }
  0x48   :  { %314 = shalt.err (!%p311_p12)
}
  0x49   :  { %s315_s25 = scalar_lea.hbm %s560_s3, 16 }
  0x4a   :  { %p316_p13 = scmp.ne.s32.totalorder %s560_s3, %s315_s25  ;;  %p319_p0 = scmp.lt.u32.totalorder %s315_s25, %s560_s3 }
  0x4c   :  { %p321_p1 = pnand %p319_p0, %p316_p13 }
  0x4e   :  { %324 = shalt.err (!%p321_p1)
}
  0x4f   :  { %225 = dma.vmem_to_hbm [thread:$0]  %s223_s2, 16, %s560_s3, [#allocation3]  }
  0x50   :  { %329 = dma.done.wait [#allocation3], 16  }
  0x51   :  { %330 = vsyncadd [#allocation3], 4294967280 }
  0x52   :  { %229 = vsyncpa [#allocation3], 1 }
  0x53   :  { %230 = vsyncpa [#allocation4], 1 }
  0x54   :  { %231 = vsyncpa [#allocation5], 1 }

</bundles_post_ra>
